<compile_context>
chip_gen: v5e
topology: v5e:2x2
jax: 0.10.0
libtpu: 0.0.40
codegen_flags: <defaults>
</compile_context>

<pallas_src>
import jax
import jax.numpy as jnp
from jax.experimental import pallas as pl
from jax.experimental.pallas import tpu as pltpu


def _cat_kernel(x2_ref, y2_ref, z3_ref, w3_ref, o0_ref, o1_ref, o2_ref):
    # out0: per-batch channel concat.  Lane offset Cx*H*W is a multiple of 128
    # for the test shapes -> dense, unmasked full-tile stores.
    o0_ref[...] = jnp.concatenate([x2_ref[...], y2_ref[...]], axis=1)

    # out1: width concat on the contiguous (N*C, H, W) views -- the concat
    # lands on the minor (lane) axis in-register; no wrapper transposes.
    o1_ref[...] = jnp.concatenate([z3_ref[...], w3_ref[...]], axis=2)

    # out2: height concat == duplicate w along the sublane axis.  Reuses the
    # same w view, so w is read from HBM exactly once.
    o2_ref[...] = jnp.concatenate([w3_ref[...], w3_ref[...]], axis=1)


def torch_cat_model(x, y, z, w):
    """Pallas equivalent of Model.forward. Inputs are NCHW jnp arrays."""
    N, Cx, H, W = x.shape
    _, Cy, _, _ = y.shape
    Nz, Cz, Hz, Wz = z.shape
    _, _, _, Ww = w.shape
    assert y.shape == (N, Cy, H, W), "x/y must match on N,H,W"
    assert w.shape == (Nz, Cz, Hz, Ww), "z/w must match on N,C,H"
    assert x.dtype == y.dtype, "cat((x,y)) requires matching dtypes"
    assert z.dtype == w.dtype, "cat((z,w)) requires matching dtypes"

    # --- wrapper-side views: all contiguous reshapes, zero transposes --------
    x2 = x.reshape(N, Cx * H * W)          # (2, 768)
    y2 = y.reshape(N, Cy * H * W)          # (2, 1280)
    z3 = z.reshape(Nz * Cz, Hz, Wz)        # (8, 16, 8)
    w3 = w.reshape(Nz * Cz, Hz, Ww)        # (8, 16, 8) -- single copy of w

    out_shapes = (
        jax.ShapeDtypeStruct((N, (Cx + Cy) * H * W), x.dtype),       # out0 slab
        jax.ShapeDtypeStruct((Nz * Cz, Hz, Wz + Ww), z.dtype),       # out1
        jax.ShapeDtypeStruct((Nz * Cz, 2 * Hz, Ww), w.dtype),        # out2
    )

    # Pure data movement: flops = 0, bytes = every input + output byte.
    bytes_in = (x.size * x.dtype.itemsize + y.size * y.dtype.itemsize
                + z.size * z.dtype.itemsize + w.size * w.dtype.itemsize)
    bytes_out = (N * (Cx + Cy) * H * W * x.dtype.itemsize
                 + Nz * Cz * Hz * (Wz + Ww) * z.dtype.itemsize
                 + Nz * Cz * 2 * Hz * Ww * w.dtype.itemsize)
    cost = pl.CostEstimate(flops=0, transcendentals=0,
                           bytes_accessed=bytes_in + bytes_out)

    # Tiny arrays: whole-array VMEM blocks, single fused launch, no grid.
    o0_2d, o1_3d, o2_3d = pl.pallas_call(
        _cat_kernel,
        out_shape=out_shapes,
        in_specs=[pl.BlockSpec(memory_space=pltpu.VMEM)] * 4,
        out_specs=(
            pl.BlockSpec(memory_space=pltpu.VMEM),
            pl.BlockSpec(memory_space=pltpu.VMEM),
            pl.BlockSpec(memory_space=pltpu.VMEM),
        ),
        cost_estimate=cost,
    )(x2, y2, z3, w3)

    # --- reshape back to NCHW: contiguous reshapes only (no transposes) -----
    out0 = o0_2d.reshape(N, Cx + Cy, H, W)
    out1 = o1_3d.reshape(Nz, Cz, Hz, Wz + Ww)
    out2 = o2_3d.reshape(Nz, Cz, 2 * Hz, Ww)
    return out0, out1, out2


if __name__ == "__main__":
    key = jax.random.PRNGKey(0)
    kx, ky, kz, kw = jax.random.split(key, 4)

    # Small NCHW shapes consistent with the forward pass:
    #   x,y share all dims except C; z,w share all dims except W.
    x = jax.random.normal(kx, (2, 3, 16, 16), dtype=jnp.float32)
    y = jax.random.normal(ky, (2, 5, 16, 16), dtype=jnp.float32)
    z = jax.random.normal(kz, (2, 4, 16, 8), dtype=jnp.float32)
    w = jax.random.normal(kw, (2, 4, 16, 8), dtype=jnp.float32)

    out0, out1, out2 = jax.block_until_ready(torch_cat_model(x, y, z, w))

    # Reference check against plain JAX concatenation.
    ref0 = jnp.concatenate((x, y), axis=1)
    ref1 = jnp.concatenate((z, w), axis=3)
    ref2 = jnp.concatenate((w, w), axis=2)
    assert out0.shape == ref0.shape and jnp.array_equal(out0, ref0)
    assert out1.shape == ref1.shape and jnp.array_equal(out1, ref1)
    assert out2.shape == ref2.shape and jnp.array_equal(out2, ref2)

    print("KERNEL_OK")
</pallas_src>

<mosaic_0001>
module attributes {stable_mosaic.version = 11 : i64} {
  func.func @_cat_kernel(%arg0: memref<2x768xf32, #tpu.memory_space<vmem>>, %arg1: memref<2x1280xf32, #tpu.memory_space<vmem>>, %arg2: memref<8x16x8xf32, #tpu.memory_space<vmem>>, %arg3: memref<8x16x8xf32, #tpu.memory_space<vmem>>, %arg4: memref<2x2048xf32, #tpu.memory_space<vmem>>, %arg5: memref<8x16x16xf32, #tpu.memory_space<vmem>>, %arg6: memref<8x32x8xf32, #tpu.memory_space<vmem>>) attributes {dimension_semantics = [], scalar_prefetch = 0 : i64, scratch_operands = 0 : i64, tpu.core_type = #tpu.core_type<tc>} {
    %c0 = arith.constant 0 : index
    %c0_0 = arith.constant 0 : index
    %0 = vector.load %arg0[%c0, %c0_0] : memref<2x768xf32, #tpu.memory_space<vmem>>, vector<2x768xf32>
    %c0_1 = arith.constant 0 : index
    %c0_2 = arith.constant 0 : index
    %1 = vector.load %arg1[%c0_1, %c0_2] : memref<2x1280xf32, #tpu.memory_space<vmem>>, vector<2x1280xf32>
    %2 = tpu.concatenate %0, %1 in 1 : vector<2x768xf32>, vector<2x1280xf32> -> vector<2x2048xf32>
    %c0_3 = arith.constant 0 : index
    %c0_4 = arith.constant 0 : index
    %3 = vector.load %arg4[%c0_3, %c0_4] : memref<2x2048xf32, #tpu.memory_space<vmem>>, vector<2x2048xf32>
    tpu.vector_store %arg4[%c0_3, %c0_4], %2 {strides = array<i32>} : memref<2x2048xf32, #tpu.memory_space<vmem>>, vector<2x2048xf32>,
    %c0_5 = arith.constant 0 : index
    %c0_6 = arith.constant 0 : index
    %c0_7 = arith.constant 0 : index
    %4 = vector.load %arg2[%c0_5, %c0_6, %c0_7] : memref<8x16x8xf32, #tpu.memory_space<vmem>>, vector<8x16x8xf32>
    %c0_8 = arith.constant 0 : index
    %c0_9 = arith.constant 0 : index
    %c0_10 = arith.constant 0 : index
    %5 = vector.load %arg3[%c0_8, %c0_9, %c0_10] : memref<8x16x8xf32, #tpu.memory_space<vmem>>, vector<8x16x8xf32>
    %6 = tpu.concatenate %4, %5 in 2 : vector<8x16x8xf32>, vector<8x16x8xf32> -> vector<8x16x16xf32>
    %c0_11 = arith.constant 0 : index
    %c0_12 = arith.constant 0 : index
    %c0_13 = arith.constant 0 : index
    %7 = vector.load %arg5[%c0_11, %c0_12, %c0_13] : memref<8x16x16xf32, #tpu.memory_space<vmem>>, vector<8x16x16xf32>
    tpu.vector_store %arg5[%c0_11, %c0_12, %c0_13], %6 {strides = array<i32>} : memref<8x16x16xf32, #tpu.memory_space<vmem>>, vector<8x16x16xf32>,
    %c0_14 = arith.constant 0 : index
    %c0_15 = arith.constant 0 : index
    %c0_16 = arith.constant 0 : index
    %8 = vector.load %arg3[%c0_14, %c0_15, %c0_16] : memref<8x16x8xf32, #tpu.memory_space<vmem>>, vector<8x16x8xf32>
    %c0_17 = arith.constant 0 : index
    %c0_18 = arith.constant 0 : index
    %c0_19 = arith.constant 0 : index
    %9 = vector.load %arg3[%c0_17, %c0_18, %c0_19] : memref<8x16x8xf32, #tpu.memory_space<vmem>>, vector<8x16x8xf32>
    %10 = tpu.concatenate %8, %9 in 1 : vector<8x16x8xf32>, vector<8x16x8xf32> -> vector<8x32x8xf32>
    %c0_20 = arith.constant 0 : index
    %c0_21 = arith.constant 0 : index
    %c0_22 = arith.constant 0 : index
    %11 = vector.load %arg6[%c0_20, %c0_21, %c0_22] : memref<8x32x8xf32, #tpu.memory_space<vmem>>, vector<8x32x8xf32>
    tpu.vector_store %arg6[%c0_20, %c0_21, %c0_22], %10 {strides = array<i32>} : memref<8x32x8xf32, #tpu.memory_space<vmem>>, vector<8x32x8xf32>,
    return
  }
}

</mosaic_0001>

<bundles_post_ra>
// kernel: tpu_custom_call.1
= control target key start
LH: loop header
LB: loop body
LE: loop exit
PB: predicated region body
PF: predicated region fallthrough
CT: control target
= control target key end

     0   :  { %12 = vsyncpa [#allocation3], 0  ;;  %s362_s25 = smov 8   ;;  %s710_s0 = inlined_call_operand.vmem [shape: f32[2,768], index: 0, kind: input, shape index: {}]   ;;  %s711_s1 = inlined_call_operand.vmem [shape: f32[2,1280], index: 1, kind: input, shape index: {}]   ;;  %s712_s2 = inlined_call_operand.vmem [shape: f32[8,16,8], index: 2, kind: input, shape index: {}]   ;;  %s713_s3 = inlined_call_operand.vmem [shape: f32[8,16,8], index: 3, kind: input, shape index: {}]   ;;  %s714_s4 = inlined_call_operand.hbm [shape: f32[2,2048], index: 4, kind: output, shape index: {0}]   ;;  %s715_s5 = inlined_call_operand.hbm [shape: f32[8,16,16], index: 5, kind: output, shape index: {1}]   ;;  %s716_s6 = inlined_call_operand.vmem [shape: f32[8,32,8], index: 6, kind: output, shape index: {2}]  }
   0x1   :  { %v106_v0 = vld [vmem:[%s713_s3] sm:$0xff]  ;;  %v108_v1 = vld [vmem:[%s713_s3 + $0x10] sm:$0xff] }
   0x2   :  { %138 = vrot.lane.b32.xlu0 %v106_v0, %s362_s25  ;;  %142 = vrot.lane.b32.xlu1 %v108_v1, %s362_s25  ;;  %v110_v2 = vld [vmem:[%s713_s3 + $0x20] sm:$0xff] }
   0x3   :  { %146 = vrot.lane.b32.xlu2 %v110_v2, %s362_s25 }
   0x4   :  { %13 = vsyncpa [#allocation5], 0  ;;  %v107_v3 = vld [vmem:[%s713_s3 + $0x8] sm:$0xff]  ;;  %v109_v4 = vld [vmem:[%s713_s3 + $0x18] sm:$0xff]  ;;  %vm186_vm0 = vcmask 64512   ;;  %vm203_vm1 = vcmask 130048  }
   0x5   :  { %v111_v5 = vld [vmem:[%s713_s3 + $0x28] sm:$0xff]  ;;  %236 = vst.msk [vmem:[%s716_s6] sm:$0xff] %vm186_vm0, %v106_v0  ;;  %v112_v6 = vld [vmem:[%s713_s3 + $0x30] sm:$0xff]  ;;  %v113_v7 = vld [vmem:[%s713_s3 + $0x38] sm:$0xff]  ;;  %vm67_vm2 = vcmask 1041408   ;;  %vm69_vm3 = vcmask 1045508  }
   0x6   :  { %237 = vst.msk [vmem:[%s716_s6 + $0x8] sm:$0xff] %vm186_vm0, %v107_v3  ;;  %v114_v8 = vld [vmem:[%s713_s3 + $0x40] sm:$0xff]  ;;  %v115_v9 = vld [vmem:[%s713_s3 + $0x48] sm:$0xff]  ;;  %v116_v10 = vld [vmem:[%s713_s3 + $0x50] sm:$0xff]  ;;  %vm71_vm4 = vcmask 1043456   ;;  %s363_s30 = smov [#allocation2]  }
   0x7   :  { %238 = vst.msk [vmem:[%s716_s6 + $0x10] sm:$0xff] %vm186_vm0, %v106_v0  ;;  %v117_v11 = vld [vmem:[%s713_s3 + $0x58] sm:$0xff]  ;;  %v118_v12 = vld [vmem:[%s713_s3 + $0x60] sm:$0xff]  ;;  %v119_v13 = vld [vmem:[%s713_s3 + $0x68] sm:$0xff]  ;;  %s275_s9 = sshll.u32 %s714_s4, 4  ;;  %s364_s16 = smov [#allocation4]   ;;  %s276_s9 = int_to_ptr.hbm [resolvable:$true] %s275_s9 }
   0x8   :  { %239 = vst.msk [vmem:[%s716_s6 + $0x18] sm:$0xff] %vm186_vm0, %v107_v3  ;;  %v120_v14 = vld [vmem:[%s713_s3 + $0x70] sm:$0xff]  ;;  %v121_v15 = vld [vmem:[%s713_s3 + $0x78] sm:$0xff]  ;;  %v94_v16 = vld [vmem:[%s712_s2 + $0x20] sm:$0xff]  ;;  %s283_s17 = sshll.u32 %s364_s16, 4  ;;  %s285_s20 = sshll.u32 %s715_s5, 4  ;;  %s284_s17 = int_to_ptr.vmem [resolvable:$true] %s283_s17  ;;  %s286_s20 = int_to_ptr.hbm [resolvable:$true] %s285_s20 }
   0x9   :  { %240 = vst.msk [vmem:[%s716_s6 + $0x20] sm:$0xff] %vm186_vm0, %v108_v1  ;;  %v22_v19 = vld [vmem:[%s710_s0] sm:$0xff]  ;;  %v95_v20 = vld [vmem:[%s712_s2 + $0x28] sm:$0xff]  ;;  %v92_v35 = vld [vmem:[%s712_s2 + $0x10] sm:$0xff]  ;;  %s365_s23 = smov 128  }
   0xa   :  { %140 = vrot.lane.b32.xlu0 %v107_v3, %s362_s25  ;;  %144 = vrot.lane.b32.xlu1 %v109_v4, %s362_s25  ;;  %241 = vst.msk [vmem:[%s716_s6 + $0x28] sm:$0xff] %vm186_vm0, %v109_v4  ;;  %v23_v23 = vld [vmem:[%s710_s0 + $0x8] sm:$0xf] }
   0xb   :  { %148 = vrot.lane.b32.xlu2 %v111_v5, %s362_s25  ;;  %242 = vst.msk [vmem:[%s716_s6 + $0x30] sm:$0xff] %vm186_vm0, %v108_v1  ;;  %v24_v24 = vld [vmem:[%s711_s1] sm:$0xff]  ;;  %v25_v32 = vld [vmem:[%s711_s1 + $0x8] sm:$0xff] }
   0xc   :  { %243 = vst.msk [vmem:[%s716_s6 + $0x38] sm:$0xff] %vm186_vm0, %v109_v4  ;;  %v98_v29 = vld [vmem:[%s712_s2 + $0x40] sm:$0xff]  ;;  %v101_v39 = vld [vmem:[%s712_s2 + $0x58] sm:$0xff]  ;;  %v26_v46 = vld [vmem:[%s711_s1 + $0x10] sm:$0xf] }
   0xd   :  { %244 = vst.msk [vmem:[%s716_s6 + $0x40] sm:$0xff] %vm186_vm0, %v110_v2  ;;  %v90_v34 = vld [vmem:[%s712_s2] sm:$0xff]  ;;  %v91_v49 = vld [vmem:[%s712_s2 + $0x8] sm:$0xff]  ;;  %v93_v50 = vld [vmem:[%s712_s2 + $0x18] sm:$0xff] }
   0xe   :  { %245 = vst.msk [vmem:[%s716_s6 + $0x48] sm:$0xff] %vm186_vm0, %v111_v5  ;;  %v104_v56 = vld [vmem:[%s712_s2 + $0x70] sm:$0xff] }
   0xf   :  { %246 = vst.msk [vmem:[%s716_s6 + $0x50] sm:$0xff] %vm186_vm0, %v110_v2 }
  0x10   :  { %247 = vst.msk [vmem:[%s716_s6 + $0x58] sm:$0xff] %vm186_vm0, %v111_v5 }
  0x11   :  { %248 = vst.msk [vmem:[%s716_s6 + $0x60] sm:$0xff] %vm186_vm0, %v112_v6 }
  0x12   :  { %150 = vrot.lane.b32.xlu0 %v112_v6, %s362_s25  ;;  %152 = vrot.lane.b32.xlu1 %v113_v7, %s362_s25  ;;  %249 = vst.msk [vmem:[%s716_s6 + $0x68] sm:$0xff] %vm186_vm0, %v113_v7 }
  0x13   :  { %154 = vrot.lane.b32.xlu2 %v114_v8, %s362_s25  ;;  %250 = vst.msk [vmem:[%s716_s6 + $0x70] sm:$0xff] %vm186_vm0, %v112_v6 }
  0x14   :  { %251 = vst.msk [vmem:[%s716_s6 + $0x78] sm:$0xff] %vm186_vm0, %v113_v7 }
  0x15   :  { %252 = vst.msk [vmem:[%s716_s6 + $0x80] sm:$0xff] %vm186_vm0, %v114_v8 }
  0x16   :  { %253 = vst.msk [vmem:[%s716_s6 + $0x88] sm:$0xff] %vm186_vm0, %v115_v9 }
  0x17   :  { %254 = vst.msk [vmem:[%s716_s6 + $0x90] sm:$0xff] %vm186_vm0, %v114_v8 }
  0x18   :  { %255 = vst.msk [vmem:[%s716_s6 + $0x98] sm:$0xff] %vm186_vm0, %v115_v9 }
  0x19   :  { %256 = vst.msk [vmem:[%s716_s6 + $0xa0] sm:$0xff] %vm186_vm0, %v116_v10 }
  0x1a   :  { %156 = vrot.lane.b32.xlu0 %v115_v9, %s362_s25  ;;  %158 = vrot.lane.b32.xlu1 %v116_v10, %s362_s25  ;;  %257 = vst.msk [vmem:[%s716_s6 + $0xa8] sm:$0xff] %vm186_vm0, %v117_v11 }
  0x1b   :  { %160 = vrot.lane.b32.xlu2 %v117_v11, %s362_s25  ;;  %258 = vst.msk [vmem:[%s716_s6 + $0xb0] sm:$0xff] %vm186_vm0, %v116_v10 }
  0x1c   :  { %259 = vst.msk [vmem:[%s716_s6 + $0xb8] sm:$0xff] %vm186_vm0, %v117_v11 }
  0x1d   :  { %260 = vst.msk [vmem:[%s716_s6 + $0xc0] sm:$0xff] %vm186_vm0, %v118_v12 }
  0x1e   :  { %261 = vst.msk [vmem:[%s716_s6 + $0xc8] sm:$0xff] %vm186_vm0, %v119_v13 }
  0x1f   :  { %262 = vst.msk [vmem:[%s716_s6 + $0xd0] sm:$0xff] %vm186_vm0, %v118_v12 }
  0x20   :  { %263 = vst.msk [vmem:[%s716_s6 + $0xd8] sm:$0xff] %vm186_vm0, %v119_v13 }
  0x21   :  { %264 = vst.msk [vmem:[%s716_s6 + $0xe0] sm:$0xff] %vm186_vm0, %v120_v14 }
  0x22   :  { %162 = vrot.lane.b32.xlu0 %v118_v12, %s362_s25  ;;  %164 = vrot.lane.b32.xlu1 %v119_v13, %s362_s25  ;;  %265 = vst.msk [vmem:[%s716_s6 + $0xe8] sm:$0xff] %vm186_vm0, %v121_v15 }
  0x23   :  { %166 = vrot.lane.b32.xlu2 %v120_v14, %s362_s25  ;;  %266 = vst.msk [vmem:[%s716_s6 + $0xf0] sm:$0xff] %vm186_vm0, %v120_v14 }
  0x24   :  { %267 = vst.msk [vmem:[%s716_s6 + $0xf8] sm:$0xff] %vm186_vm0, %v121_v15  ;;  %s273_s6 = sshll.u32 %s363_s30, 4  ;;  %s274_s6 = int_to_ptr.vmem [resolvable:$true] %s273_s6 }
  0x25   :  { %29 = vst [vmem:[#allocation1] ss:$4 sm:$0xff] %v22_v19  ;;  %v97_v19 = vld [vmem:[%s712_s2 + $0x38] sm:$0xff] }
  0x26   :  { %31 = vst [vmem:[#allocation1 + $0x20] ss:$4 sm:$0xff] %v23_v23 }
  0x2a   :  { %168 = vrot.lane.b32.xlu0 %v121_v15, %s362_s25 }
  0x2c   :  { %v612_v25 = vld.sshfl [vmem:[#allocation1] sm:$0xff pattern:$0x73625140]  ;;  %v33_v26 = vld.sshfl [vmem:[#allocation1 + $0x8] sm:$0xff pattern:$0x73625140] }
  0x2d   :  { %v34_v27 = vld.sshfl [vmem:[#allocation1 + $0x10] sm:$0xff pattern:$0x73625140]  ;;  %v35_v28 = vld.sshfl [vmem:[#allocation1 + $0x18] sm:$0xff pattern:$0x73625140] }
  0x2e   :  { %41 = vst [vmem:[#allocation1] ss:$4 sm:$0xff] %v24_v24  ;;  %v36_v33 = vld.sshfl [vmem:[#allocation1 + $0x20] sm:$0xff pattern:$0x73625140]  ;;  %v55_v57 = vrot.slane %v33_v26, 6 }
  0x2f   :  { %v37_v36 = vld.sshfl [vmem:[#allocation1 + $0x28] sm:$0xff pattern:$0x73625140]  ;;  %v56_v58 = vrot.slane %v34_v27, 4  ;;  %v57_v59 = vrot.slane %v35_v28, 2 }
  0x30   :  { %43 = vst [vmem:[#allocation1 + $0x20] ss:$4 sm:$0xff] %v25_v32  ;;  %v58_v60 = vrot.slane %v37_v36, 6  ;;  %v68_v9 = vsel %vm67_vm2, %v612_v25, %v55_v57  ;;  %v102_v36 = vld [vmem:[%s712_s2 + $0x60] sm:$0xff] }
  0x31   :  { %v70_v10 = vsel %vm69_vm3, %v56_v58, %v57_v59 }
  0x32   :  { %v73_v11 = vsel %vm67_vm2, %v36_v33, %v58_v60  ;;  %v72_v15 = vsel %vm71_vm4, %v68_v9, %v70_v10 }
  0x33   :  { %86 = vst [vmem:[#allocation2] sm:$0xff] %v72_v15 }
  0x35   :  { %v44_v40 = vld.sshfl [vmem:[#allocation1] sm:$0xff pattern:$0x73625140]  ;;  %v45_v43 = vld.sshfl [vmem:[#allocation1 + $0x8] sm:$0xff pattern:$0x73625140] }
  0x36   :  { %v46_v44 = vld.sshfl [vmem:[#allocation1 + $0x10] sm:$0xff pattern:$0x73625140]  ;;  %v47_v47 = vld.sshfl [vmem:[#allocation1 + $0x18] sm:$0xff pattern:$0x73625140] }
  0x37   :  { %52 = vst [vmem:[#allocation1] ss:$4 sm:$0xff] %v26_v46  ;;  %v48_v51 = vld.sshfl [vmem:[#allocation1 + $0x20] sm:$0xff pattern:$0x73625140]  ;;  %v59_v0 = vrot.slane %v44_v40, 4 }
  0x38   :  { %v49_v52 = vld.sshfl [vmem:[#allocation1 + $0x28] sm:$0xff pattern:$0x73625140]  ;;  %v51_v53 = vld.sshfl [vmem:[#allocation1 + $0x38] sm:$0xff pattern:$0x73625140] }
  0x39   :  { %v50_v63 = vld.sshfl [vmem:[#allocation1 + $0x30] sm:$0xff pattern:$0x73625140]  ;;  %v60_v1 = vrot.slane %v45_v43, 2  ;;  %v61_v3 = vrot.slane %v47_v47, 6  ;;  %v62_v4 = vrot.slane %v48_v51, 4 }
  0x3a   :  { %v63_v5 = vrot.slane %v49_v52, 2  ;;  %v64_v6 = vrot.slane %v51_v53, 6 }
  0x3b   :  { %v74_v12 = vsel %vm69_vm3, %v59_v0, %v60_v1 }
  0x3e   :  { %v53_v8 = vld.sshfl [vmem:[#allocation1] sm:$0xff pattern:$0x73625140]  ;;  %v54_v13 = vld.sshfl [vmem:[#allocation1 + $0x8] sm:$0xff pattern:$0x73625140] }
  0x3f   :  { %v65_v14 = vrot.slane %v53_v8, 4 }
  0x5d   :  { %v147_v17 = vpop.permute.xlu2 %146 }
  0x5e   :  { %v191_v18 = vsel %vm186_vm0, %v94_v16, %v147_v17  ;;  %v75_v16 = vsel %vm71_vm4, %v73_v11, %v74_v12  ;;  %v76_v17 = vsel %vm67_vm2, %v46_v44, %v61_v3 }
  0x5f   :  { %208 = vst.msk [vmem:[#allocation4 + $0x20] sm:$0xff] %vm203_vm1, %v191_v18  ;;  %v96_v18 = vld [vmem:[%s712_s2 + $0x30] sm:$0xff] }
  0x60   :  { %87 = vst [vmem:[#allocation2 + $0x8] sm:$0xff] %v75_v16 }
  0x65   :  { %v149_v21 = vpop.permute.xlu2 %148 }
  0x66   :  { %v192_v22 = vsel %vm186_vm0, %v95_v20, %v149_v21  ;;  %v66_v20 = vrot.slane %v54_v13, 2  ;;  %v77_v21 = vsel %vm69_vm3, %v62_v4, %v63_v5 }
  0x67   :  { %209 = vst.msk [vmem:[#allocation4 + $0x28] sm:$0xff] %vm203_vm1, %v192_v22  ;;  %v79_v22 = vsel %vm67_vm2, %v50_v63, %v64_v6  ;;  %v78_v23 = vsel %vm71_vm4, %v76_v17, %v77_v21 }
  0x68   :  { %v80_v26 = vsel %vm69_vm3, %v65_v14, %v66_v20  ;;  %88 = vst [vmem:[#allocation2 + $0x10] sm:$0xff] %v78_v23 }
  0x6d   :  { %v155_v30 = vpop.permute.xlu2 %154 }
  0x6e   :  { %v195_v31 = vsel %vm186_vm0, %v98_v29, %v155_v30  ;;  %v81_v29 = vsel %vm71_vm4, %v79_v22, %v80_v26  ;;  %v99_v30 = vld [vmem:[%s712_s2 + $0x48] sm:$0xff] }
  0x6f   :  { %212 = vst.msk [vmem:[#allocation4 + $0x40] sm:$0xff] %vm203_vm1, %v195_v31  ;;  %v100_v31 = vld [vmem:[%s712_s2 + $0x50] sm:$0xff] }
  0x70   :  { %89 = vst [vmem:[#allocation2 + $0x18] sm:$0xff] %v81_v29 }
  0x71   :  { %278 = dma.vmem_to_hbm [thread:$0]  %s274_s6, 512, %s276_s9, [#allocation3]  }
  0x74   :  { %v139_v37 = vpop.permute.xlu0 %138  ;;  %v143_v38 = vpop.permute.xlu1 %142 }
  0x75   :  { %v187_v41 = vsel %vm186_vm0, %v90_v34, %v139_v37  ;;  %v189_v42 = vsel %vm186_vm0, %v92_v35, %v143_v38  ;;  %v161_v45 = vpop.permute.xlu2 %160  ;;  %v103_v37 = vld [vmem:[%s712_s2 + $0x68] sm:$0xff] }
  0x76   :  { %204 = vst.msk [vmem:[#allocation4] sm:$0xff] %vm203_vm1, %v187_v41  ;;  %v198_v48 = vsel %vm186_vm0, %v101_v39, %v161_v45 }
  0x77   :  { %206 = vst.msk [vmem:[#allocation4 + $0x10] sm:$0xff] %vm203_vm1, %v189_v42  ;;  %v105_v42 = vld [vmem:[%s712_s2 + $0x78] sm:$0xff] }
  0x78   :  { %215 = vst.msk [vmem:[#allocation4 + $0x58] sm:$0xff] %vm203_vm1, %v198_v48 }
  0x7c   :  { %v141_v54 = vpop.permute.xlu0 %140  ;;  %v145_v55 = vpop.permute.xlu1 %144 }
  0x7d   :  { %v188_v61 = vsel %vm186_vm0, %v91_v49, %v141_v54  ;;  %v190_v62 = vsel %vm186_vm0, %v93_v50, %v145_v55  ;;  %v167_v2 = vpop.permute.xlu2 %166 }
  0x7e   :  { %205 = vst.msk [vmem:[#allocation4 + $0x8] sm:$0xff] %vm203_vm1, %v188_v61  ;;  %v201_v7 = vsel %vm186_vm0, %v104_v56, %v167_v2 }
  0x7f   :  { %207 = vst.msk [vmem:[#allocation4 + $0x18] sm:$0xff] %vm203_vm1, %v190_v62 }
  0x80   :  { %218 = vst.msk [vmem:[#allocation4 + $0x70] sm:$0xff] %vm203_vm1, %v201_v7 }
  0x84   :  { %v151_v24 = vpop.permute.xlu0 %150  ;;  %v153_v25 = vpop.permute.xlu1 %152 }
  0x85   :  { %v193_v27 = vsel %vm186_vm0, %v96_v18, %v151_v24  ;;  %v194_v28 = vsel %vm186_vm0, %v97_v19, %v153_v25 }
  0x86   :  { %210 = vst.msk [vmem:[#allocation4 + $0x30] sm:$0xff] %vm203_vm1, %v193_v27 }
  0x87   :  { %211 = vst.msk [vmem:[#allocation4 + $0x38] sm:$0xff] %vm203_vm1, %v194_v28 }
  0x8c   :  { %v157_v32 = vpop.permute.xlu0 %156  ;;  %v159_v33 = vpop.permute.xlu1 %158 }
  0x8d   :  { %v196_v34 = vsel %vm186_vm0, %v99_v30, %v157_v32  ;;  %v197_v35 = vsel %vm186_vm0, %v100_v31, %v159_v33 }
  0x8e   :  { %213 = vst.msk [vmem:[#allocation4 + $0x48] sm:$0xff] %vm203_vm1, %v196_v34 }
  0x8f   :  { %214 = vst.msk [vmem:[#allocation4 + $0x50] sm:$0xff] %vm203_vm1, %v197_v35 }
  0x94   :  { %v163_v38 = vpop.permute.xlu0 %162  ;;  %v165_v39 = vpop.permute.xlu1 %164 }
  0x95   :  { %v199_v40 = vsel %vm186_vm0, %v102_v36, %v163_v38  ;;  %v200_v41 = vsel %vm186_vm0, %v103_v37, %v165_v39 }
  0x96   :  { %216 = vst.msk [vmem:[#allocation4 + $0x60] sm:$0xff] %vm203_vm1, %v199_v40 }
  0x97   :  { %217 = vst.msk [vmem:[#allocation4 + $0x68] sm:$0xff] %vm203_vm1, %v200_v41 }
  0x9c   :  { %v169_v43 = vpop.permute.xlu0 %168 }
  0x9d   :  { %v202_v44 = vsel %vm186_vm0, %v105_v42, %v169_v43 }
  0x9e   :  { %219 = vst.msk [vmem:[#allocation4 + $0x78] sm:$0xff] %vm203_vm1, %v202_v44 }
  0x9f   :  { %291 = dma.vmem_to_hbm [thread:$0]  %s284_s17, 2048, %s286_s20, [#allocation5], %s365_s23, %s365_s23, %s362_s25  }
  0xa0   :  { %358 = dma.done.wait [#allocation3], 512  }
  0xa1   :  { %359 = vsyncadd [#allocation3], 4294966784 }
  0xa2   :  { %360 = dma.done.wait [#allocation5], 2048  }
  0xa3   :  { %361 = vsyncadd [#allocation5], 4294965248 }
  0xa4   :  { %304 = vsyncpa [#allocation3], 1 }
  0xa5   :  { %305 = vsyncpa [#allocation5], 1 }

</bundles_post_ra>
